<compile_context>
chip_gen: v6e
topology: v6e:2x2x1
jax: 0.10.0
libtpu: 0.0.40
codegen_flags: <defaults>
</compile_context>

<pallas_src>
import functools

import jax
import jax.numpy as jnp
from jax.experimental import pallas as pl
from jax.experimental.pallas import tpu as pltpu

# Layer sizes, mirroring the PyTorch module's __init__.
LAYER_DIMS = [9, 256, 128, 64, 32, 9]
NUM_LAYERS = len(LAYER_DIMS) - 1
BIAS_PAD = 512          # lane-aligned packing width for the bias rows (>= 256)
TB_MAX = 1024           # max batch tile (rows per grid step)
SPLIT_THRESHOLD = 512   # batches >= this get >= 2 grid steps (v7x megacore)


def _round_up(n, m):
    return ((n + m - 1) // m) * m


def _choose_tile(batch):
    """Batch tile: as fat as possible, but >= 2 grid steps for big batches."""
    b8 = _round_up(batch, 8)
    if b8 >= SPLIT_THRESHOLD:
        # Cap at ~half the batch so a 2-TC chip (v7x) keeps both cores busy.
        return min(TB_MAX, _round_up(pl.cdiv(b8, 2), 8))
    return b8  # single fat tile; too small to be worth splitting


def _vmem_limit_bytes(tb):
    """Conservative footprint estimate (lane-padded, double-buffered) + headroom."""
    lane = lambda n: _round_up(n, 128)
    sub = lambda n: _round_up(n, 8)
    io = 2 * 2 * tb * lane(LAYER_DIMS[0]) * 4                    # x + out blocks
    wb = 2 * sum(sub(LAYER_DIMS[i]) * lane(LAYER_DIMS[i + 1]) * 2
                 for i in range(NUM_LAYERS))                     # bf16 weights
    wb += 2 * 8 * BIAS_PAD * 4                                   # packed biases
    act = tb * sum(lane(d) * 6 for d in LAYER_DIMS[1:])          # f32 + bf16 acts
    total = io + wb + act
    return int(min(max(total * 3 // 2, 16 * 1024 * 1024), 48 * 1024 * 1024))


def dqn_kernel(x_ref, w1_ref, w2_ref, w3_ref, w4_ref, w5_ref, b_ref, out_ref):
    """Fused 5-layer MLP forward for one (TB, 9) batch tile.

    Weights are bf16 (MXU operands); bias-add / ReLU / accumulation in f32.
    b_ref is the packed (5, 512) bias buffer; static slices are free.
    """
    bf16 = jnp.bfloat16
    f32 = jnp.float32
    w_refs = (w1_ref, w2_ref, w3_ref, w4_ref, w5_ref)

    h = x_ref[...].astype(bf16)
    for li, w_ref in enumerate(w_refs):
        dout = LAYER_DIMS[li + 1]
        b = b_ref[li:li + 1, 0:dout]                      # static slice, (1, dout)
        h = jnp.dot(h, w_ref[...], preferred_element_type=f32) + b
        if li < NUM_LAYERS - 1:
            h = jnp.maximum(h, 0.0).astype(bf16)          # ReLU in f32, cast for MXU
    out_ref[...] = h                                      # final layer: no ReLU, f32


@jax.jit
def dqn_forward(x, weights, bias_packed):
    """x: (B, 9) float32.  weights: 5 bf16 arrays (in, out).  bias_packed: (5, 512) f32."""
    B = x.shape[0]
    x = x.astype(jnp.float32)

    tb = _choose_tile(B)
    padded_b = _round_up(B, tb)
    if padded_b != B:
        x = jnp.pad(x, ((0, padded_b - B), (0, 0)))
    grid = (padded_b // tb,)

    # x / out: tiled along batch (auto double-buffered).  Weights / packed bias:
    # full-extent, constant index_map -> grid-invariant, DMA'd once, VMEM-resident.
    in_specs = [pl.BlockSpec((tb, LAYER_DIMS[0]), lambda i: (i, 0))]
    for li in range(NUM_LAYERS):
        din, dout = LAYER_DIMS[li], LAYER_DIMS[li + 1]
        in_specs.append(pl.BlockSpec((din, dout), lambda i: (0, 0)))   # weight
    in_specs.append(pl.BlockSpec((NUM_LAYERS, BIAS_PAD), lambda i: (0, 0)))  # biases
    out_spec = pl.BlockSpec((tb, LAYER_DIMS[-1]), lambda i: (i, 0))

    # Advisory cost estimate for XLA's scheduler.
    matmul_flops = 2 * padded_b * sum(
        LAYER_DIMS[i] * LAYER_DIMS[i + 1] for i in range(NUM_LAYERS))
    weight_bytes = sum(
        LAYER_DIMS[i] * LAYER_DIMS[i + 1] * 2 for i in range(NUM_LAYERS))
    bias_bytes = NUM_LAYERS * BIAS_PAD * 4
    io_bytes = padded_b * (LAYER_DIMS[0] + LAYER_DIMS[-1]) * 4
    cost = pl.CostEstimate(flops=matmul_flops, transcendentals=0,
                           bytes_accessed=weight_bytes + bias_bytes + io_bytes)

    out = pl.pallas_call(
        dqn_kernel,
        out_shape=jax.ShapeDtypeStruct((padded_b, LAYER_DIMS[-1]), jnp.float32),
        grid=grid,
        in_specs=in_specs,
        out_specs=out_spec,
        compiler_params=pltpu.CompilerParams(
            dimension_semantics=("parallel",),            # megacore sharding on v7x
            vmem_limit_bytes=_vmem_limit_bytes(tb)),      # guard v5e's 16 MiB default
        cost_estimate=cost,
    )(x, *weights, bias_packed)

    return out[:B]


def init_params(key):
    """Deterministic init matching nn.Linear shapes.

    PyTorch's nn.Linear(in, out) holds weight (out, in); generate with that
    shape, transpose to (in, out) for the x @ W convention, and cast the
    weight (MXU operand) to bf16.  Biases stay f32, packed into one (5, 512)
    buffer (row i = layer-i bias, zero-padded).
    """
    weights = []
    bias_rows = []
    for i in range(NUM_LAYERS):
        fan_in, fan_out = LAYER_DIMS[i], LAYER_DIMS[i + 1]
        key, kw, kb = jax.random.split(key, 3)
        bound = 1.0 / jnp.sqrt(float(fan_in))
        w_pt = jax.random.uniform(kw, (fan_out, fan_in), jnp.float32, -bound, bound)
        b_pt = jax.random.uniform(kb, (fan_out,), jnp.float32, -bound, bound)
        weights.append(w_pt.T.astype(jnp.bfloat16))
        bias_rows.append(jnp.pad(b_pt, (0, BIAS_PAD - fan_out)))
    bias_packed = jnp.stack(bias_rows).astype(jnp.float32)   # (5, 512)
    return weights, bias_packed


def dqn_reference(x, weights, bias_packed):
    """Plain-JAX reference with the same dtype discipline as the kernel."""
    h = x.astype(jnp.float32)
    for i, w in enumerate(weights):
        b = bias_packed[i, :LAYER_DIMS[i + 1]]
        h = jnp.dot(h.astype(jnp.bfloat16), w,
                    preferred_element_type=jnp.float32) + b
        if i < NUM_LAYERS - 1:
            h = jnp.maximum(h, 0.0)
    return h


if __name__ == "__main__":
    key = jax.random.PRNGKey(0)
    key, kx = jax.random.split(key)
    weights, bias_packed = init_params(key)

    # Small RL-style batch of flattened tic-tac-toe boards: single fat tile.
    x_small = jax.random.uniform(kx, (32, 9), jnp.float32, -1.0, 1.0)
    out_small = jax.block_until_ready(dqn_forward(x_small, weights, bias_packed))
    ref_small = dqn_reference(x_small, weights, bias_packed)
    assert out_small.shape == (32, 9)
    assert jnp.allclose(out_small, ref_small, atol=2e-2, rtol=2e-2), (
        float(jnp.max(jnp.abs(out_small - ref_small))))

    # Larger batch: exercises the 2-step "parallel" grid (v7x megacore path)
    # and the batch padding (1000 -> 1008 rows, 2 x 504-row tiles).
    key, kx2 = jax.random.split(key)
    x_big = jax.random.uniform(kx2, (1000, 9), jnp.float32, -1.0, 1.0)
    out_big = jax.block_until_ready(dqn_forward(x_big, weights, bias_packed))
    ref_big = dqn_reference(x_big, weights, bias_packed)
    assert out_big.shape == (1000, 9)
    assert jnp.allclose(out_big, ref_big, atol=2e-2, rtol=2e-2), (
        float(jnp.max(jnp.abs(out_big - ref_big))))

    print("KERNEL_OK")
</pallas_src>

<mosaic_0001>
module attributes {stable_mosaic.version = 11 : i64} {
  func.func @dqn_kernel(%arg0: i32, %arg1: memref<32x9xf32, #tpu.memory_space<vmem>>, %arg2: memref<9x256xbf16, #tpu.memory_space<vmem>>, %arg3: memref<256x128xbf16, #tpu.memory_space<vmem>>, %arg4: memref<128x64xbf16, #tpu.memory_space<vmem>>, %arg5: memref<64x32xbf16, #tpu.memory_space<vmem>>, %arg6: memref<32x9xbf16, #tpu.memory_space<vmem>>, %arg7: memref<5x512xf32, #tpu.memory_space<vmem>>, %arg8: memref<32x9xf32, #tpu.memory_space<vmem>>) attributes {dimension_semantics = [#tpu.dimension_semantics<parallel>], iteration_bounds = array<i64: 1>, scalar_prefetch = 0 : i64, scratch_operands = 0 : i64, tpu.core_type = #tpu.core_type<tc>, window_params = [{transform_indices = @transform_0, window_bounds = array<i64: 32, 9>}, {pipeline_mode = #tpu.pipeline_mode<synchronous>, transform_indices = @transform_1, window_bounds = array<i64: 9, 256>}, {pipeline_mode = #tpu.pipeline_mode<synchronous>, transform_indices = @transform_2, window_bounds = array<i64: 256, 128>}, {pipeline_mode = #tpu.pipeline_mode<synchronous>, transform_indices = @transform_3, window_bounds = array<i64: 128, 64>}, {pipeline_mode = #tpu.pipeline_mode<synchronous>, transform_indices = @transform_4, window_bounds = array<i64: 64, 32>}, {pipeline_mode = #tpu.pipeline_mode<synchronous>, transform_indices = @transform_5, window_bounds = array<i64: 32, 9>}, {pipeline_mode = #tpu.pipeline_mode<synchronous>, transform_indices = @transform_6, window_bounds = array<i64: 5, 512>}, {transform_indices = @transform_7, window_bounds = array<i64: 32, 9>}]} {
    %c0 = arith.constant 0 : index
    %c0_0 = arith.constant 0 : index
    %0 = vector.load %arg1[%c0, %c0_0] : memref<32x9xf32, #tpu.memory_space<vmem>>, vector<32x9xf32>
    %1 = arith.truncf %0 : vector<32x9xf32> to vector<32x9xbf16>
    %c0_1 = arith.constant 0 : index
    %c0_2 = arith.constant 0 : index
    %2 = vector.load %arg7[%c0_1, %c0_2] : memref<5x512xf32, #tpu.memory_space<vmem>>, vector<1x256xf32>
    %c0_3 = arith.constant 0 : index
    %c0_4 = arith.constant 0 : index
    %3 = vector.load %arg2[%c0_3, %c0_4] : memref<9x256xbf16, #tpu.memory_space<vmem>>, vector<9x256xbf16>
    %cst = arith.constant dense<0.000000e+00> : vector<32x256xf32>
    %4 = tpu.matmul %1, %3, %cst {dimension_numbers = #tpu.dot_dimension_numbers<[1], [0], [0], [1], [0, 0, 1, 1], [], []>} : vector<32x9xbf16>, vector<9x256xbf16>, vector<32x256xf32> -> vector<32x256xf32>
    %5 = vector.broadcast %2 : vector<1x256xf32> to vector<32x256xf32>
    %6 = arith.addf %4, %5 : vector<32x256xf32>
    %cst_5 = arith.constant 0.000000e+00 : f32
    %7 = vector.broadcast %cst_5 : f32 to vector<32x256xf32>
    %8 = arith.maximumf %6, %7 : vector<32x256xf32>
    %9 = arith.truncf %8 : vector<32x256xf32> to vector<32x256xbf16>
    %c1 = arith.constant 1 : index
    %c0_6 = arith.constant 0 : index
    %10 = vector.load %arg7[%c1, %c0_6] : memref<5x512xf32, #tpu.memory_space<vmem>>, vector<1x128xf32>
    %c0_7 = arith.constant 0 : index
    %c0_8 = arith.constant 0 : index
    %11 = vector.load %arg3[%c0_7, %c0_8] : memref<256x128xbf16, #tpu.memory_space<vmem>>, vector<256x128xbf16>
    %cst_9 = arith.constant dense<0.000000e+00> : vector<32x128xf32>
    %12 = tpu.matmul %9, %11, %cst_9 {dimension_numbers = #tpu.dot_dimension_numbers<[1], [0], [0], [1], [0, 0, 1, 1], [], []>} : vector<32x256xbf16>, vector<256x128xbf16>, vector<32x128xf32> -> vector<32x128xf32>
    %13 = vector.broadcast %10 : vector<1x128xf32> to vector<32x128xf32>
    %14 = arith.addf %12, %13 : vector<32x128xf32>
    %cst_10 = arith.constant 0.000000e+00 : f32
    %15 = vector.broadcast %cst_10 : f32 to vector<32x128xf32>
    %16 = arith.maximumf %14, %15 : vector<32x128xf32>
    %17 = arith.truncf %16 : vector<32x128xf32> to vector<32x128xbf16>
    %c2 = arith.constant 2 : index
    %c0_11 = arith.constant 0 : index
    %18 = vector.load %arg7[%c2, %c0_11] : memref<5x512xf32, #tpu.memory_space<vmem>>, vector<1x64xf32>
    %c0_12 = arith.constant 0 : index
    %c0_13 = arith.constant 0 : index
    %19 = vector.load %arg4[%c0_12, %c0_13] : memref<128x64xbf16, #tpu.memory_space<vmem>>, vector<128x64xbf16>
    %cst_14 = arith.constant dense<0.000000e+00> : vector<32x64xf32>
    %20 = tpu.matmul %17, %19, %cst_14 {dimension_numbers = #tpu.dot_dimension_numbers<[1], [0], [0], [1], [0, 0, 1, 1], [], []>} : vector<32x128xbf16>, vector<128x64xbf16>, vector<32x64xf32> -> vector<32x64xf32>
    %21 = vector.broadcast %18 : vector<1x64xf32> to vector<32x64xf32>
    %22 = arith.addf %20, %21 : vector<32x64xf32>
    %cst_15 = arith.constant 0.000000e+00 : f32
    %23 = vector.broadcast %cst_15 : f32 to vector<32x64xf32>
    %24 = arith.maximumf %22, %23 : vector<32x64xf32>
    %25 = arith.truncf %24 : vector<32x64xf32> to vector<32x64xbf16>
    %c3 = arith.constant 3 : index
    %c0_16 = arith.constant 0 : index
    %26 = vector.load %arg7[%c3, %c0_16] : memref<5x512xf32, #tpu.memory_space<vmem>>, vector<1x32xf32>
    %c0_17 = arith.constant 0 : index
    %c0_18 = arith.constant 0 : index
    %27 = vector.load %arg5[%c0_17, %c0_18] : memref<64x32xbf16, #tpu.memory_space<vmem>>, vector<64x32xbf16>
    %cst_19 = arith.constant dense<0.000000e+00> : vector<32x32xf32>
    %28 = tpu.matmul %25, %27, %cst_19 {dimension_numbers = #tpu.dot_dimension_numbers<[1], [0], [0], [1], [0, 0, 1, 1], [], []>} : vector<32x64xbf16>, vector<64x32xbf16>, vector<32x32xf32> -> vector<32x32xf32>
    %29 = vector.broadcast %26 : vector<1x32xf32> to vector<32x32xf32>
    %30 = arith.addf %28, %29 : vector<32x32xf32>
    %cst_20 = arith.constant 0.000000e+00 : f32
    %31 = vector.broadcast %cst_20 : f32 to vector<32x32xf32>
    %32 = arith.maximumf %30, %31 : vector<32x32xf32>
    %33 = arith.truncf %32 : vector<32x32xf32> to vector<32x32xbf16>
    %c4 = arith.constant 4 : index
    %c0_21 = arith.constant 0 : index
    %34 = vector.load %arg7[%c4, %c0_21] : memref<5x512xf32, #tpu.memory_space<vmem>>, vector<1x9xf32>
    %c0_22 = arith.constant 0 : index
    %c0_23 = arith.constant 0 : index
    %35 = vector.load %arg6[%c0_22, %c0_23] : memref<32x9xbf16, #tpu.memory_space<vmem>>, vector<32x9xbf16>
    %cst_24 = arith.constant dense<0.000000e+00> : vector<32x9xf32>
    %36 = tpu.matmul %33, %35, %cst_24 {dimension_numbers = #tpu.dot_dimension_numbers<[1], [0], [0], [1], [0, 0, 1, 1], [], []>} : vector<32x32xbf16>, vector<32x9xbf16>, vector<32x9xf32> -> vector<32x9xf32>
    %37 = vector.broadcast %34 : vector<1x9xf32> to vector<32x9xf32>
    %38 = arith.addf %36, %37 : vector<32x9xf32>
    %c0_25 = arith.constant 0 : index
    %c0_26 = arith.constant 0 : index
    %39 = vector.load %arg8[%c0_25, %c0_26] : memref<32x9xf32, #tpu.memory_space<vmem>>, vector<32x9xf32>
    tpu.vector_store %arg8[%c0_25, %c0_26], %38 {strides = array<i32>} : memref<32x9xf32, #tpu.memory_space<vmem>>, vector<32x9xf32>,
    return
  }
  func.func @transform_0(%arg0: i32) -> (i32, i32) {
    %c0_i32 = arith.constant 0 : i32
    %c0_i32_0 = arith.constant 0 : i32
    return %arg0, %c0_i32 : i32, i32
  }
  func.func @transform_1(%arg0: i32) -> (i32, i32) {
    %c0_i32 = arith.constant 0 : i32
    %c0_i32_0 = arith.constant 0 : i32
    %c0_i32_1 = arith.constant 0 : i32
    return %c0_i32, %c0_i32_0 : i32, i32
  }
  func.func @transform_2(%arg0: i32) -> (i32, i32) {
    %c0_i32 = arith.constant 0 : i32
    %c0_i32_0 = arith.constant 0 : i32
    %c0_i32_1 = arith.constant 0 : i32
    return %c0_i32, %c0_i32_0 : i32, i32
  }
  func.func @transform_3(%arg0: i32) -> (i32, i32) {
    %c0_i32 = arith.constant 0 : i32
    %c0_i32_0 = arith.constant 0 : i32
    %c0_i32_1 = arith.constant 0 : i32
    return %c0_i32, %c0_i32_0 : i32, i32
  }
  func.func @transform_4(%arg0: i32) -> (i32, i32) {
    %c0_i32 = arith.constant 0 : i32
    %c0_i32_0 = arith.constant 0 : i32
    %c0_i32_1 = arith.constant 0 : i32
    return %c0_i32, %c0_i32_0 : i32, i32
  }
  func.func @transform_5(%arg0: i32) -> (i32, i32) {
    %c0_i32 = arith.constant 0 : i32
    %c0_i32_0 = arith.constant 0 : i32
    %c0_i32_1 = arith.constant 0 : i32
    return %c0_i32, %c0_i32_0 : i32, i32
  }
  func.func @transform_6(%arg0: i32) -> (i32, i32) {
    %c0_i32 = arith.constant 0 : i32
    %c0_i32_0 = arith.constant 0 : i32
    %c0_i32_1 = arith.constant 0 : i32
    return %c0_i32, %c0_i32_0 : i32, i32
  }
  func.func @transform_7(%arg0: i32) -> (i32, i32) {
    %c0_i32 = arith.constant 0 : i32
    %c0_i32_0 = arith.constant 0 : i32
    return %arg0, %c0_i32 : i32, i32
  }
}

</mosaic_0001>

<bundles_post_ra>
// kernel: dqn_forward.1
= control target key start
LH: loop header
LB: loop body
LE: loop exit
PB: predicated region body
PF: predicated region fallthrough
CT: control target
= control target key end

     0   :  { %12 = vsyncpa [#allocation3], 0  ;;  %s818_s24 = smov [#allocation2]   ;;  %s1001_s0 = inlined_call_operand.vmem [shape: f32[32,9], index: 0, kind: input, shape index: {}]   ;;  %s1002_s1 = inlined_call_operand.hbm [shape: bf16[9,256], index: 1, kind: input, shape index: {}]   ;;  %s1003_s2 = inlined_call_operand.vmem [shape: bf16[256,128], index: 2, kind: input, shape index: {}]   ;;  %s1004_s3 = inlined_call_operand.vmem [shape: bf16[128,64], index: 3, kind: input, shape index: {}]   ;;  %s1005_s4 = inlined_call_operand.vmem [shape: bf16[64,32], index: 4, kind: input, shape index: {}]   ;;  %s1006_s5 = inlined_call_operand.vmem [shape: bf16[32,9], index: 5, kind: input, shape index: {}]   ;;  %s1007_s6 = inlined_call_operand.vmem [shape: f32[5,512], index: 6, kind: input, shape index: {}]   ;;  %s1008_s7 = inlined_call_operand.vmem [shape: f32[32,9], index: 7, kind: output, shape index: {}]  }
   0x1   :  { %s20_s25 = sshll.u32 %s818_s24, 4  ;;  %s21_s25 = int_to_ptr.vmem [resolvable:$true] %s20_s25 }
   0x2   :  { %s804_s26 = scalar_lea.vmem %s21_s25, 256  ;;  %p809_p1 = scmp.lt.s32.totalorder %s21_s25, %s21_s25 }
   0x3   :  { %p805_p0 = scmp.ne.s32.totalorder %s21_s25, %s804_s26  ;;  %p810_p2 = scmp.lt.s32.totalorder %s804_s26, %s804_s26 }
   0x5   :  { %p811_p3 = por %p810_p2, %p809_p1 }
   0x7   :  { %p812_p4 = pnand %p811_p3, %p805_p0 }
   0x9   :  { %815 = shalt.err (!%p812_p4)
}
   0xa   :  { %s819_s27 = smov 128   ;;  %s820_s28 = smov 8  }
   0xb   :  { %26 = dma.hbm_to_vmem [thread:$0]  %s1002_s1, 256, %s21_s25, [#allocation3], %s819_s27, %s819_s27, %s820_s28  }
   0xc   :  { %816 = dma.done.wait [#allocation3], 256  }
   0xd   :  { %817 = vsyncadd [#allocation3], 4294967040  ;;  %vm76_vm0 = vcmask 1043456   ;;  %v821_v0 = vmov 0   ;;  %vm77_vm1 = vcmask 1044480   ;;  %v822_v1 = vmov 65535  }
   0xe   :  { %118 = vmatprep.mubr.bf16.mxu0 %v821_v0  ;;  %v78_v2 = vsel %vm76_vm0, 4294967295, %v822_v1  ;;  %v763_v4 = vld [vmem:[#allocation2 + $0x4] ss:$8 sps:$4 sm:$0x1f]   ;;  %v766_v10 = vld [vmem:[%s1003_s2 + $0x78] sm:$0xff]   ;;  %vm69_vm2 = vcmask 72704   ;;  %v51_v33 = vlaneseq }
   0xf   :  { %v79_v3 = vsel %vm77_vm1, %v78_v2, 0  ;;  %v765_v5 = vld [vmem:[#allocation2] ss:$8 sps:$4 sm:$0x1f]   ;;  %v767_v12 = vld [vmem:[%s1003_s2 + $0x38] sm:$0xff]   ;;  %670 = vmatprep.subr.bf16.mxu1 %v766_v10  ;;  %v768_v13 = vld [vmem:[%s1003_s2 + $0x70] sm:$0xff]  }
  0x10   :  { %v41_v6 = vld [vmem:[%s1001_s0] sm:$0xff]  ;;  %v42_v7 = vld [vmem:[%s1001_s0 + $0x8] sm:$0xff]  ;;  %v84_v8 = vand.u32 %v763_v4, %v79_v3  ;;  %v81_v9 = vand.u32 %v765_v5, %v79_v3  ;;  %671 = vmatpush3.bf16.msra.mxu1 %v767_v12  ;;  %v769_v14 = vld [vmem:[%s1003_s2 + $0x30] sm:$0xff]   ;;  %v52_v34 = vshrl.u32 %v51_v33, 7  ;;  %vm488_vm3 = vcmask 523264  }
  0x11   :  { %v45_v11 = vpack.c.bf16 %v42_v7, %v41_v6  ;;  %672 = vmatprep.subr.bf16.mxu1 %v768_v13  ;;  %v770_v15 = vld [vmem:[%s1003_s2 + $0x68] sm:$0xff]   ;;  %v43_v16 = vld [vmem:[%s1001_s0 + $0x10] sm:$0xff]  ;;  %v44_v17 = vld [vmem:[%s1001_s0 + $0x18] sm:$0xff]  ;;  %vm567_vm4 = vcmask 261120  }
  0x12   :  { %100 = vmatprep.subr.bf16.mxu0 %v84_v8  ;;  %v771_v18 = vld [vmem:[%s1003_s2 + $0x28] sm:$0xff]   ;;  %v772_v19 = vld [vmem:[%s1003_s2 + $0x60] sm:$0xff]   ;;  %v46_v20 = vpack.c.bf16 %v44_v17, %v43_v16  ;;  %v774_v22 = vld [vmem:[%s1003_s2 + $0x58] sm:$0xff]   ;;  %v57_v35 = vsub.s32 1, %v52_v34  ;;  %v53_v36 = vsub.s32 0, %v52_v34 }
  0x13   :  { %101 = vmatpush1.bf16.msra.mxu0 %v81_v9  ;;  %v773_v21 = vld [vmem:[%s1003_s2 + $0x20] sm:$0xff]   ;;  %v775_v23 = vld [vmem:[%s1003_s2 + $0x18] sm:$0xff]   ;;  %v776_v24 = vld [vmem:[%s1003_s2 + $0x50] sm:$0xff]  }
  0x14   :  { %673 = vmatpush3.bf16.msra.mxu1 %v769_v14  ;;  %v777_v25 = vld [vmem:[%s1003_s2 + $0x10] sm:$0xff]   ;;  %v778_v26 = vld [vmem:[%s1003_s2 + $0x48] sm:$0xff]   ;;  %v780_v28 = vld [vmem:[%s1003_s2 + $0x40] sm:$0xff]  }
  0x15   :  { %674 = vmatprep.subr.bf16.mxu1 %v770_v15  ;;  %v779_v27 = vld [vmem:[%s1003_s2 + $0x8] sm:$0xff]   ;;  %v781_v29 = vld [vmem:[%s1003_s2] sm:$0xff]   ;;  %v782_v30 = vld [vmem:[%s1004_s3 + $0x38] sm:$0xff]  }
  0x16   :  { %634 = vmatmul.mubr.msk.bf16.vlgmr.msra.gmra.mxu0 %vm69_vm2, %v45_v11  ;;  %v783_v31 = vld [vmem:[%s1004_s3 + $0x30] sm:$0xff]   ;;  %718 = vmatprep.subr.bf16.mxu0 %v782_v30  ;;  %v784_v32 = vld [vmem:[%s1004_s3 + $0x28] sm:$0xff]   ;;  %v785_v4 = vld [vmem:[%s1004_s3 + $0x20] sm:$0xff]  }
  0x17   :  { %128 = vmatprep.mubr.bf16.mxu0 %v821_v0  ;;  %719 = vmatpush3.bf16.msra.mxu0 %v782_v30  ;;  %v47_v37 = vld [vmem:[%s1007_s6] ss:$8 sm:$0x3]  ;;  %v786_v5 = vld [vmem:[%s1004_s3 + $0x18] sm:$0xff]   ;;  %v787_v6 = vld [vmem:[%s1004_s3 + $0x10] sm:$0xff]  }
  0x18   :  { %675 = vmatpush3.bf16.msra.mxu1 %v771_v18  ;;  %720 = vmatprep.subr.bf16.mxu0 %v783_v31  ;;  %v58_v39 = vrot.slane %v47_v37, %v57_v35  ;;  %v54_v40 = vrot.slane %v47_v37, %v53_v36  ;;  %v788_v7 = vld [vmem:[%s1004_s3 + $0x8] sm:$0xff]   ;;  %v789_v8 = vld [vmem:[%s1004_s3] sm:$0xff]   ;;  %v790_v9 = vld [vmem:[%s1005_s4 + $0x18] sm:$0xff]  }
  0x19   :  { %676 = vmatprep.subr.bf16.mxu1 %v772_v19  ;;  %v151_v13 = vld [vmem:[%s1007_s6 + $0x1] ss:$0 sm:$0xff]  ;;  %v791_v33 = vld [vmem:[%s1005_s4 + $0x10] sm:$0xff]   ;;  %v792_v34 = vld [vmem:[%s1005_s4 + $0x8] sm:$0xff]  }
  0x1a   :  { %v793_v35 = vld [vmem:[%s1005_s4] sm:$0xff]  }
  0x1b   :  { %721 = vmatpush3.bf16.msra.mxu0 %v783_v31 }
  0x1c   :  { %677 = vmatpush3.bf16.msra.mxu1 %v773_v21  ;;  %722 = vmatprep.subr.bf16.mxu0 %v784_v32 }
  0x1d   :  { %678 = vmatprep.subr.bf16.mxu1 %v774_v22 }
  0x1e   :  { %635 = vmatmul.mubr.msk.bf16.gmra.mxu0 %vm69_vm2, %v46_v20 }
  0x1f   :  { %723 = vmatpush3.bf16.msra.mxu0 %v784_v32 }
  0x20   :  { %679 = vmatpush3.bf16.msra.mxu1 %v775_v23  ;;  %724 = vmatprep.subr.bf16.mxu0 %v785_v4 }
  0x21   :  { %680 = vmatprep.subr.bf16.mxu1 %v776_v24 }
  0x23   :  { %725 = vmatpush3.bf16.msra.mxu0 %v785_v4  ;;  %v550_v4 = vld [vmem:[%s1007_s6 + $0x4] ss:$0 sm:$0xff] }
  0x24   :  { %681 = vmatpush3.bf16.msra.mxu1 %v777_v25  ;;  %726 = vmatprep.subr.bf16.mxu0 %v786_v5 }
  0x25   :  { %682 = vmatprep.subr.bf16.mxu1 %v778_v26 }
  0x27   :  { %727 = vmatpush3.bf16.msra.mxu0 %v786_v5 }
  0x28   :  { %683 = vmatpush3.bf16.msra.mxu1 %v779_v27  ;;  %728 = vmatprep.subr.bf16.mxu0 %v787_v6 }
  0x29   :  { %684 = vmatprep.subr.bf16.mxu1 %v780_v28 }
  0x2b   :  { %729 = vmatpush3.bf16.msra.mxu0 %v787_v6 }
  0x2c   :  { %685 = vmatpush3.bf16.msra.mxu1 %v781_v29  ;;  %730 = vmatprep.subr.bf16.mxu0 %v788_v7 }
  0x2d   :  { %738 = vmatprep.subr.bf16.mxu1 %v790_v9 }
  0x2f   :  { %731 = vmatpush3.bf16.msra.mxu0 %v788_v7 }
  0x30   :  { %732 = vmatprep.subr.bf16.mxu0 %v789_v8 }
  0x33   :  { %733 = vmatpush3.bf16.msra.mxu0 %v789_v8 }
  0xd6   :  { %v120_v38 = vpop.f32.mrf.mxu0 }
  0xd7   :  { %v121_v45 = vadd.f32 %v120_v38, %v54_v40  ;;  %v335_v38 = vld [vmem:[%s1007_s6 + $0x2] ss:$0 sm:$0xff] }
  0xd8   :  { %v122_v41 = vpop.f32.mrf.mxu0 }
  0xd9   :  { %v123_v43 = vadd.f32 %v122_v41, %v58_v39  ;;  %v139_v52 = vmax.f32 %v121_v45, 0.0 }
  0xda   :  { %v124_v42 = vpop.f32.mrf.mxu0 }
  0xdb   :  { %v125_v44 = vadd.f32 %v124_v42, %v54_v40  ;;  %v140_v50 = vmax.f32 %v123_v43, 0.0 }
  0xdc   :  { %v126_v46 = vpop.f32.mrf.mxu0 }
  0xdd   :  { %v127_v47 = vadd.f32 %v126_v46, %v58_v39  ;;  %v141_v48 = vmax.f32 %v125_v44, 0.0 }
  0xde   :  { %v130_v49 = vpop.f32.mrf.mxu0 }
  0xdf   :  { %v142_v51 = vmax.f32 %v127_v47, 0.0  ;;  %v147_v55 = vpack.c.bf16 %v141_v48, %v139_v52  ;;  %v131_v59 = vadd.f32 %v130_v49, %v54_v40  ;;  %v795_v52 = vld [vmem:[%s1006_s5] sm:$0xff]  }
  0xe0   :  { %v132_v53 = vpop.f32.mrf.mxu0 }
  0xe1   :  { %v148_v54 = vpack.c.bf16 %v142_v51, %v140_v50  ;;  %v133_v57 = vadd.f32 %v132_v53, %v58_v39  ;;  %v143_v1 = vmax.f32 %v131_v59, 0.0  ;;  %v794_v51 = vld [vmem:[%s1006_s5 + $0x8] sm:$0xff]  }
  0xe2   :  { %v134_v56 = vpop.f32.mrf.mxu0  ;;  %750 = vmatprep.subr.bf16.mxu0 %v794_v51 }
  0xe3   :  { %v135_v58 = vadd.f32 %v134_v56, %v54_v40  ;;  %312 = vmatprep.mubr.bf16.mxu1 %v148_v54  ;;  %v144_v63 = vmax.f32 %v133_v57, 0.0 }
  0xe4   :  { %v136_v60 = vpop.f32.mrf.mxu0  ;;  %313 = vmatmul.mubr.bf16.vlgmr.msra.gmra.mxu1 %v147_v55  ;;  %v455_v55 = vld [vmem:[%s1007_s6 + $0x3] ss:$0 sm:$0xff] }
  0xe5   :  { %v137_v61 = vadd.f32 %v136_v60, %v58_v39  ;;  %v145_v62 = vmax.f32 %v135_v58, 0.0  ;;  %739 = vmatpush3.bf16.msra.mxu1 %v790_v9 }
  0xe6   :  { %740 = vmatprep.subr.bf16.mxu1 %v791_v33 }
  0xe7   :  { %v146_v0 = vmax.f32 %v137_v61, 0.0  ;;  %v149_v3 = vpack.c.bf16 %v145_v62, %v143_v1 }
  0xe9   :  { %v150_v2 = vpack.c.bf16 %v146_v0, %v144_v63  ;;  %741 = vmatpush3.bf16.msra.mxu1 %v791_v33 }
  0xea   :  { %742 = vmatprep.subr.bf16.mxu1 %v792_v34 }
  0xeb   :  { %320 = vmatprep.mubr.bf16.mxu1 %v150_v2 }
  0xec   :  { %321 = vmatmul.mubr.bf16.gmra.mxu1 %v149_v3 }
  0xed   :  { %743 = vmatpush3.bf16.msra.mxu1 %v792_v34 }
  0xee   :  { %744 = vmatprep.subr.bf16.mxu1 %v793_v35 }
  0xf1   :  { %745 = vmatpush3.bf16.msra.mxu1 %v793_v35 }
 0x1a4   :  { %v686_v10 = vpop.f32.mrf.mxu1 }
 0x1a6   :  { %v687_v11 = vpop.f32.mrf.mxu1 }
 0x1a7   :  { %v688_v12 = vadd.f32 %v687_v11, %v686_v10 }
 0x1a8   :  { %v689_v14 = vpop.f32.mrf.mxu1 }
 0x1a9   :  { %v315_v16 = vadd.f32 %v688_v12, %v151_v13 }
 0x1aa   :  { %v690_v15 = vpop.f32.mrf.mxu1 }
 0x1ab   :  { %v691_v17 = vadd.f32 %v690_v15, %v689_v14  ;;  %v329_v21 = vmax.f32 %v315_v16, 0.0 }
 0x1ac   :  { %v692_v18 = vpop.f32.mrf.mxu1 }
 0x1ad   :  { %v318_v19 = vadd.f32 %v691_v17, %v151_v13 }
 0x1ae   :  { %v693_v20 = vpop.f32.mrf.mxu1 }
 0x1af   :  { %v330_v22 = vmax.f32 %v318_v19, 0.0  ;;  %v694_v23 = vadd.f32 %v693_v20, %v692_v18 }
 0x1b0   :  { %v695_v24 = vpop.f32.mrf.mxu1 }
 0x1b1   :  { %v333_v25 = vpack.c.bf16 %v330_v22, %v329_v21  ;;  %v323_v27 = vadd.f32 %v694_v23, %v151_v13 }
 0x1b2   :  { %v696_v26 = vpop.f32.mrf.mxu1 }
 0x1b3   :  { %v697_v28 = vadd.f32 %v696_v26, %v695_v24  ;;  %734 = vmatprep.mubr.bf16.mxu0 %v333_v25  ;;  %v331_v30 = vmax.f32 %v323_v27, 0.0 }
 0x1b5   :  { %v326_v29 = vadd.f32 %v697_v28, %v151_v13 }
 0x1b7   :  { %v332_v31 = vmax.f32 %v326_v29, 0.0 }
 0x1b9   :  { %v334_v32 = vpack.c.bf16 %v332_v31, %v331_v30 }
 0x1bb   :  { %735 = vmatmul.mubr.bf16.vlgmr.msra.gmra.mxu0 %v334_v32 }
 0x1bc   :  { %751 = vmatpush3.bf16.msra.mxu0 %v794_v51 }
 0x1bd   :  { %752 = vmatprep.subr.bf16.mxu0 %v795_v52 }
 0x1c0   :  { %753 = vmatpush3.bf16.msra.mxu0 %v795_v52 }
 0x27b   :  { %v736_v36 = vpop.f32.mrf.mxu0 }
 0x27c   :  { %v443_v42 = vadd.f32 %v736_v36, %v335_v38 }
 0x27d   :  { %v434_v37 = vpop.f32.mrf.mxu0 }
 0x27e   :  { %v435_v40 = vadd.f32 %v434_v37, %v335_v38  ;;  %v451_v48 = vmax.f32 %v443_v42, 0.0 }
 0x27f   :  { %v737_v39 = vpop.f32.mrf.mxu0 }
 0x280   :  { %v446_v41 = vadd.f32 %v737_v39, %v335_v38  ;;  %v449_v46 = vmax.f32 %v435_v40, 0.0 }
 0x281   :  { %v437_v43 = vpop.f32.mrf.mxu0 }
 0x282   :  { %v438_v44 = vadd.f32 %v437_v43, %v335_v38  ;;  %v452_v45 = vmax.f32 %v446_v41, 0.0 }
 0x284   :  { %v450_v47 = vmax.f32 %v438_v44, 0.0  ;;  %v454_v50 = vpack.c.bf16 %v452_v45, %v451_v48 }
 0x286   :  { %v453_v49 = vpack.c.bf16 %v450_v47, %v449_v46 }
 0x288   :  { %746 = vmatprep.mubr.msk.bf16.mxu1 %vm488_vm3, %v453_v49 }
 0x289   :  { %747 = vmatmul.mubr.msk.bf16.vlgmr.msra.gmra.mxu1 %vm488_vm3, %v454_v50 }
 0x349   :  { %v748_v53 = vpop.f32.mrf.mxu1 }
 0x34a   :  { %v538_v59 = vadd.f32 %v748_v53, %v455_v55 }
 0x34b   :  { %v529_v54 = vpop.f32.mrf.mxu1 }
 0x34c   :  { %v530_v57 = vadd.f32 %v529_v54, %v455_v55  ;;  %v546_v1 = vmax.f32 %v538_v59, 0.0 }
 0x34d   :  { %v749_v56 = vpop.f32.mrf.mxu1 }
 0x34e   :  { %v541_v58 = vadd.f32 %v749_v56, %v455_v55  ;;  %v544_v63 = vmax.f32 %v530_v57, 0.0 }
 0x34f   :  { %v532_v60 = vpop.f32.mrf.mxu1 }
 0x350   :  { %v533_v61 = vadd.f32 %v532_v60, %v455_v55  ;;  %v547_v62 = vmax.f32 %v541_v58, 0.0 }
 0x352   :  { %v545_v0 = vmax.f32 %v533_v61, 0.0  ;;  %v549_v3 = vpack.c.bf16 %v547_v62, %v546_v1 }
 0x354   :  { %v548_v2 = vpack.c.bf16 %v545_v0, %v544_v63 }
 0x356   :  { %754 = vmatprep.mubr.msk.bf16.mxu0 %vm567_vm4, %v548_v2 }
 0x357   :  { %755 = vmatmul.mubr.msk.bf16.vlgmr.msra.gmra.mxu0 %vm567_vm4, %v549_v3 }
 0x417   :  { %v756_v5 = vpop.f32.mrf.mxu0 }
 0x418   :  { %v617_v6 = vadd.f32 %v756_v5, %v550_v4 }
 0x419   :  { %v608_v7 = vpop.f32.mrf.mxu0 }
 0x41a   :  { %625 = vst.msk [vmem:[%s1008_s7 + $0x10] sm:$0xff] %vm69_vm2, %v617_v6  ;;  %v609_v8 = vadd.f32 %v608_v7, %v550_v4 }
 0x41b   :  { %v757_v9 = vpop.f32.mrf.mxu0 }
 0x41c   :  { %623 = vst.msk [vmem:[%s1008_s7] sm:$0xff] %vm69_vm2, %v609_v8  ;;  %v620_v10 = vadd.f32 %v757_v9, %v550_v4 }
 0x41d   :  { %v611_v11 = vpop.f32.mrf.mxu0 }
 0x41e   :  { %626 = vst.msk [vmem:[%s1008_s7 + $0x18] sm:$0xff] %vm69_vm2, %v620_v10  ;;  %v612_v12 = vadd.f32 %v611_v11, %v550_v4 }
 0x420   :  { %624 = vst.msk [vmem:[%s1008_s7 + $0x8] sm:$0xff] %vm69_vm2, %v612_v12 }
 0x421   :  { %631 = vsyncpa [#allocation3], 1 }

</bundles_post_ra>
